<compile_context>
chip_gen: v7x
topology: tpu7x:2x2x1
jax: 0.10.0
libtpu: 0.0.40
codegen_flags: <defaults>
</compile_context>

<pallas_src>
import math

import jax
import jax.numpy as jnp
from jax import lax
from jax.experimental import pallas as pl
from jax.experimental.pallas import tpu as pltpu


def _pick_tile(dim, candidates):
    for c in candidates:
        if c <= dim and dim % c == 0:
            return c
    return dim


def _largest_divisor_leq(n, cap):
    best = 1
    for c in range(1, min(cap, n) + 1):
        if n % c == 0:
            best = c
    return best


def _make_sdpa_kernel(scale, nk, tk, has_mask):
    def kernel(*refs):
        if has_mask:
            (q_ref, k_ref, v_ref, m_ref, out_ref, attn_ref,
             m_scr, l_scr, acc_scr) = refs
        else:
            (q_ref, k_ref, v_ref, out_ref, attn_ref,
             m_scr, l_scr, acc_scr) = refs
            m_ref = None

        ki = pl.program_id(2)

        @pl.when(ki == 0)
        def _init():
            m_scr[...] = jnp.full(m_scr.shape, -jnp.inf, dtype=m_scr.dtype)
            l_scr[...] = jnp.zeros(l_scr.shape, dtype=l_scr.dtype)
            acc_scr[...] = jnp.zeros(acc_scr.shape, dtype=acc_scr.dtype)

        # Fold 1/sqrt(D) into q: TQ*D multiplies instead of TQ*TK on the scores.
        q = q_ref[...] * scale            # weak-typed scale keeps the input dtype
        k = k_ref[...]
        v = v_ref[...]

        # scores = q @ k^T: contract the last dims directly on the MXU (no k.T
        # materialization), batched over the packed-head axis. f32 accumulation.
        s = lax.dot_general(
            q, k,
            dimension_numbers=(((2,), (2,)), ((0,), (0,))),
            preferred_element_type=jnp.float32)          # (G, TQ, TK) f32

        if has_mask:
            s = jnp.where(m_ref[...] == 0, -jnp.inf, s)

        # Stash raw (scaled, masked) scores in the resident attention output
        # block; the epilogue turns them into normalized softmax weights.
        if nk == 1:
            attn_ref[...] = s.astype(attn_ref.dtype)
        else:
            start = pl.multiple_of(ki * tk, tk)
            attn_ref[:, :, pl.ds(start, tk)] = s.astype(attn_ref.dtype)

        # Online (flash-style) softmax accumulation over the K-tile axis.
        m_prev = m_scr[...]
        m_new = jnp.maximum(m_prev, jnp.max(s, axis=-1, keepdims=True))
        m_scr[...] = m_new
        # Guard (-inf) - (-inf) when everything seen so far is masked; a row that
        # stays fully masked ends with l == 0 and produces NaN, matching torch.
        m_safe = jnp.where(m_new == -jnp.inf, 0.0, m_new)
        alpha = jnp.exp(m_prev - m_safe)                 # (G, TQ, 1)
        p = jnp.exp(s - m_safe)                          # (G, TQ, TK) f32

        l_scr[...] = alpha * l_scr[...] + jnp.sum(p, axis=-1, keepdims=True)
        pv = lax.dot_general(
            p.astype(v.dtype), v,                        # native-dtype MXU matmul
            dimension_numbers=(((2,), (1,)), ((0,), (0,))),
            preferred_element_type=jnp.float32)          # (G, TQ, D) f32
        acc_scr[...] = alpha * acc_scr[...] + pv

        @pl.when(ki == nk - 1)
        def _finalize():
            # Deferred normalization: one reciprocal per row, applied once in the
            # epilogue (use approx=True here if the accuracy budget allows).
            inv_l = pl.reciprocal(l_scr[...], approx=False)
            out_ref[...] = (acc_scr[...] * inv_l).astype(out_ref.dtype)
            attn = jnp.exp(attn_ref[...].astype(jnp.float32) - m_scr[...]) * inv_l
            attn_ref[...] = attn.astype(attn_ref.dtype)

    return kernel


def scaled_dot_product_attention(q, k, v, mask=None):
    """q: (B, H, Lq, D); k, v: (B, H, Lk, D); mask broadcastable to (B, H, Lq, Lk).

    Returns (output (B, H, Lq, D), attn (B, H, Lq, Lk)), like the torch module.
    """
    B, H, Lq, D = q.shape
    Lk = k.shape[-2]
    BH = B * H

    qf = q.reshape(BH, Lq, D)
    kf = k.reshape(BH, Lk, D)
    vf = v.reshape(BH, Lk, D)

    # Lane-friendly K tiles (multiple of 128 or the full dim) and sublane-friendly
    # Q tiles (multiple of 8 or the full dim). 256-wide K tiles feed the v6e/v7x
    # 256x256 MXU and map to two passes of the 128-wide v5e MXU.
    TQ = _pick_tile(Lq, (128, 64, 32, 16, 8))
    TK = _pick_tile(Lk, (256, 128))

    # Pack several heads per grid step when a single head is a tiny slab, so one
    # step does enough work to amortize per-step pipeline overhead.
    if Lq <= TQ and Lk <= TK:
        G = _largest_divisor_leq(BH, 8)
    else:
        G = 1

    n_groups = BH // G
    nq = Lq // TQ
    nk = Lk // TK
    grid = (n_groups, nq, nk)

    scale = 1.0 / math.sqrt(float(D))
    kernel = _make_sdpa_kernel(scale, nk, TK, mask is not None)

    in_specs = [
        pl.BlockSpec((G, TQ, D), lambda g, qi, ki: (g, qi, 0)),
        pl.BlockSpec((G, TK, D), lambda g, qi, ki: (g, ki, 0)),
        pl.BlockSpec((G, TK, D), lambda g, qi, ki: (g, ki, 0)),
    ]
    args = [qf, kf, vf]
    mask_block_bytes = 0
    if mask is not None:
        m4 = mask
        while m4.ndim < 4:
            m4 = m4[None]
        bh_bcast = (m4.shape[0] == 1 and m4.shape[1] == 1)
        # Expand only the Lq/Lk dims; keep int8 (4x less HBM than f32) and avoid
        # materializing the batch/head broadcast when the mask is shared.
        m4 = jnp.broadcast_to(m4, (m4.shape[0], m4.shape[1], Lq, Lk))
        keep = (m4 != 0).astype(jnp.int8)
        if bh_bcast:
            mf = keep.reshape(1, Lq, Lk)
            in_specs.append(pl.BlockSpec((1, TQ, TK), lambda g, qi, ki: (0, qi, ki)))
            mask_block_bytes = TQ * TK
        else:
            mf = jnp.broadcast_to(keep, (B, H, Lq, Lk)).reshape(BH, Lq, Lk)
            in_specs.append(pl.BlockSpec((G, TQ, TK), lambda g, qi, ki: (g, qi, ki)))
            mask_block_bytes = G * TQ * TK
        args.append(mf)

    out_specs = [
        pl.BlockSpec((G, TQ, D), lambda g, qi, ki: (g, qi, 0)),
        pl.BlockSpec((G, TQ, Lk), lambda g, qi, ki: (g, qi, 0)),
    ]
    out_shape = (
        jax.ShapeDtypeStruct((BH, Lq, D), q.dtype),
        jax.ShapeDtypeStruct((BH, Lq, Lk), q.dtype),   # attn in q.dtype (matches torch)
    )
    scratch_shapes = [
        pltpu.VMEM((G, TQ, 1), jnp.float32),   # running max
        pltpu.VMEM((G, TQ, 1), jnp.float32),   # running denom
        pltpu.VMEM((G, TQ, D), jnp.float32),   # output accumulator
    ]

    # Explicit VMEM budget: double-buffered inputs + resident outputs + scratch,
    # with headroom, capped at the smallest physical VMEM (v7x: 64 MiB).
    itemsize = jnp.dtype(q.dtype).itemsize
    est = 2 * (G * TQ * D + 2 * G * TK * D) * itemsize       # q, k, v blocks
    est += 2 * mask_block_bytes                              # int8 mask block
    est += 2 * (G * TQ * D + G * TQ * Lk) * itemsize         # out / attn blocks
    est += G * TQ * (2 + D) * 4                              # f32 scratch
    vmem_limit = int(min(64 * 1024 * 1024, max(32 * 1024 * 1024, 2 * est)))

    grid_spec = pltpu.PrefetchScalarGridSpec(
        num_scalar_prefetch=0,
        grid=grid,
        in_specs=in_specs,
        out_specs=out_specs,
        scratch_shapes=scratch_shapes,
    )

    out_flat, attn_flat = pl.pallas_call(
        kernel,
        grid_spec=grid_spec,
        out_shape=out_shape,
        compiler_params=pltpu.CompilerParams(
            dimension_semantics=("parallel", "parallel", "arbitrary"),
            vmem_limit_bytes=vmem_limit,
        ),
    )(*args)

    return (out_flat.reshape(B, H, Lq, D),
            attn_flat.reshape(B, H, Lq, Lk))


def _reference(q, k, v, mask=None):
    d = q.shape[-1]
    scores = jnp.einsum("bhqd,bhkd->bhqk", q, k) / jnp.sqrt(jnp.float32(d))
    if mask is not None:
        scores = jnp.where(mask == 0, -jnp.inf, scores)
    attn = jax.nn.softmax(scores, axis=-1)
    out = jnp.einsum("bhqk,bhkd->bhqd", attn, v)
    return out, attn


if __name__ == "__main__":
    key = jax.random.PRNGKey(0)
    kq, kk, kv, km = jax.random.split(key, 4)

    B, H, Lq, Lk, D = 2, 2, 8, 8, 32
    q = jax.random.normal(kq, (B, H, Lq, D), dtype=jnp.float32)
    k = jax.random.normal(kk, (B, H, Lk, D), dtype=jnp.float32)
    v = jax.random.normal(kv, (B, H, Lk, D), dtype=jnp.float32)
    # mask with some zeros but never a fully-masked row (torch would give NaN)
    mask = (jax.random.uniform(km, (B, H, Lq, Lk)) > 0.3).astype(jnp.float32)
    mask = mask.at[..., 0].set(1.0)

    # no-mask fast path (module's default call signature)
    out, attn = scaled_dot_product_attention(q, k, v)
    out, attn = jax.block_until_ready((out, attn))
    out_r, attn_r = _reference(q, k, v)
    assert jnp.allclose(out, out_r, atol=2e-5, rtol=2e-5), "unmasked output mismatch"
    assert jnp.allclose(attn, attn_r, atol=2e-5, rtol=2e-5), "unmasked attn mismatch"

    # masked path
    out_m, attn_m = scaled_dot_product_attention(q, k, v, mask)
    out_m, attn_m = jax.block_until_ready((out_m, attn_m))
    out_mr, attn_mr = _reference(q, k, v, mask)
    assert jnp.allclose(out_m, out_mr, atol=2e-5, rtol=2e-5), "masked output mismatch"
    assert jnp.allclose(attn_m, attn_mr, atol=2e-5, rtol=2e-5), "masked attn mismatch"

    print("KERNEL_OK")
</pallas_src>

<mosaic_0001>
module attributes {stable_mosaic.version = 11 : i64} {
  func.func @kernel(%arg0: i32, %arg1: i32, %arg2: i32, %arg3: memref<4x8x32xf32, #tpu.memory_space<vmem>>, %arg4: memref<4x8x32xf32, #tpu.memory_space<vmem>>, %arg5: memref<4x8x32xf32, #tpu.memory_space<vmem>>, %arg6: memref<4x8x32xf32, #tpu.memory_space<vmem>>, %arg7: memref<4x8x8xf32, #tpu.memory_space<vmem>>, %arg8: memref<4x8x1xf32, #tpu.memory_space<vmem>>, %arg9: memref<4x8x1xf32, #tpu.memory_space<vmem>>, %arg10: memref<4x8x32xf32, #tpu.memory_space<vmem>>) attributes {dimension_semantics = [#tpu.dimension_semantics<parallel>, #tpu.dimension_semantics<parallel>, #tpu.dimension_semantics<arbitrary>], iteration_bounds = array<i64: 1, 1, 1>, scalar_prefetch = 0 : i64, scratch_operands = 3 : i64, tpu.core_type = #tpu.core_type<tc>, window_params = [{transform_indices = @transform_0, window_bounds = array<i64: 4, 8, 32>}, {transform_indices = @transform_1, window_bounds = array<i64: 4, 8, 32>}, {transform_indices = @transform_2, window_bounds = array<i64: 4, 8, 32>}, {transform_indices = @transform_3, window_bounds = array<i64: 4, 8, 32>}, {transform_indices = @transform_4, window_bounds = array<i64: 4, 8, 8>}]} {
    %c0_i32 = arith.constant 0 : i32
    %0 = arith.cmpi eq, %arg2, %c0_i32 : i32
    %1 = arith.extui %0 : i1 to i32
    %c0_i32_0 = arith.constant 0 : i32
    %2 = arith.cmpi ne, %1, %c0_i32_0 : i32
    scf.if %2 {
      %cst_38 = arith.constant 0xFF800000 : f32
      %39 = vector.broadcast %cst_38 : f32 to vector<4x8x1xf32>
      %c0_39 = arith.constant 0 : index
      %c0_40 = arith.constant 0 : index
      %c0_41 = arith.constant 0 : index
      %40 = vector.load %arg8[%c0_39, %c0_40, %c0_41] : memref<4x8x1xf32, #tpu.memory_space<vmem>>, vector<4x8x1xf32>
      tpu.vector_store %arg8[%c0_39, %c0_40, %c0_41], %39 {strides = array<i32>} : memref<4x8x1xf32, #tpu.memory_space<vmem>>, vector<4x8x1xf32>,
      %cst_42 = arith.constant 0.000000e+00 : f32
      %41 = vector.broadcast %cst_42 : f32 to vector<4x8x1xf32>
      %c0_43 = arith.constant 0 : index
      %c0_44 = arith.constant 0 : index
      %c0_45 = arith.constant 0 : index
      %42 = vector.load %arg9[%c0_43, %c0_44, %c0_45] : memref<4x8x1xf32, #tpu.memory_space<vmem>>, vector<4x8x1xf32>
      tpu.vector_store %arg9[%c0_43, %c0_44, %c0_45], %41 {strides = array<i32>} : memref<4x8x1xf32, #tpu.memory_space<vmem>>, vector<4x8x1xf32>,
      %cst_46 = arith.constant 0.000000e+00 : f32
      %43 = vector.broadcast %cst_46 : f32 to vector<4x8x32xf32>
      %c0_47 = arith.constant 0 : index
      %c0_48 = arith.constant 0 : index
      %c0_49 = arith.constant 0 : index
      %44 = vector.load %arg10[%c0_47, %c0_48, %c0_49] : memref<4x8x32xf32, #tpu.memory_space<vmem>>, vector<4x8x32xf32>
      tpu.vector_store %arg10[%c0_47, %c0_48, %c0_49], %43 {strides = array<i32>} : memref<4x8x32xf32, #tpu.memory_space<vmem>>, vector<4x8x32xf32>,
    } else {
    }
    %c0 = arith.constant 0 : index
    %c0_1 = arith.constant 0 : index
    %c0_2 = arith.constant 0 : index
    %3 = vector.load %arg3[%c0, %c0_1, %c0_2] : memref<4x8x32xf32, #tpu.memory_space<vmem>>, vector<4x8x32xf32>
    %cst = arith.constant 0.176776692 : f32
    %4 = vector.broadcast %cst : f32 to vector<4x8x32xf32>
    %5 = arith.mulf %3, %4 : vector<4x8x32xf32>
    %c0_3 = arith.constant 0 : index
    %c0_4 = arith.constant 0 : index
    %c0_5 = arith.constant 0 : index
    %6 = vector.load %arg4[%c0_3, %c0_4, %c0_5] : memref<4x8x32xf32, #tpu.memory_space<vmem>>, vector<4x8x32xf32>
    %c0_6 = arith.constant 0 : index
    %c0_7 = arith.constant 0 : index
    %c0_8 = arith.constant 0 : index
    %7 = vector.load %arg5[%c0_6, %c0_7, %c0_8] : memref<4x8x32xf32, #tpu.memory_space<vmem>>, vector<4x8x32xf32>
    %cst_9 = arith.constant dense<0.000000e+00> : vector<4x8x8xf32>
    %8 = tpu.matmul %5, %6, %cst_9 {dimension_numbers = #tpu.dot_dimension_numbers<[2], [2], [1], [1], [0, 0, 0, 1, 1, 1], [0], [0]>} : vector<4x8x32xf32>, vector<4x8x32xf32>, vector<4x8x8xf32> -> vector<4x8x8xf32>
    %c0_10 = arith.constant 0 : index
    %c0_11 = arith.constant 0 : index
    %c0_12 = arith.constant 0 : index
    %9 = vector.load %arg7[%c0_10, %c0_11, %c0_12] : memref<4x8x8xf32, #tpu.memory_space<vmem>>, vector<4x8x8xf32>
    tpu.vector_store %arg7[%c0_10, %c0_11, %c0_12], %8 {strides = array<i32>} : memref<4x8x8xf32, #tpu.memory_space<vmem>>, vector<4x8x8xf32>,
    %c0_13 = arith.constant 0 : index
    %c0_14 = arith.constant 0 : index
    %c0_15 = arith.constant 0 : index
    %10 = vector.load %arg8[%c0_13, %c0_14, %c0_15] : memref<4x8x1xf32, #tpu.memory_space<vmem>>, vector<4x8x1xf32>
    %cst_16 = arith.constant dense<0xFF800000> : vector<4x8xf32>
    %11 = vector.multi_reduction <maximumf>, %8, %cst_16 [2] : vector<4x8x8xf32> to vector<4x8xf32>
    %12 = vector.shape_cast %11 : vector<4x8xf32> to vector<4x8x1xf32>
    %13 = arith.maximumf %10, %12 : vector<4x8x1xf32>
    %c0_17 = arith.constant 0 : index
    %c0_18 = arith.constant 0 : index
    %c0_19 = arith.constant 0 : index
    %14 = vector.load %arg8[%c0_17, %c0_18, %c0_19] : memref<4x8x1xf32, #tpu.memory_space<vmem>>, vector<4x8x1xf32>
    tpu.vector_store %arg8[%c0_17, %c0_18, %c0_19], %13 {strides = array<i32>} : memref<4x8x1xf32, #tpu.memory_space<vmem>>, vector<4x8x1xf32>,
    %cst_20 = arith.constant 0xFF800000 : f32
    %15 = vector.broadcast %cst_20 : f32 to vector<4x8x1xf32>
    %16 = arith.cmpf oeq, %13, %15 : vector<4x8x1xf32>
    %cst_21 = arith.constant 0.000000e+00 : f32
    %17 = vector.broadcast %cst_21 : f32 to vector<4x8x1xf32>
    %18 = arith.select %16, %17, %13 : vector<4x8x1xi1>, vector<4x8x1xf32>
    %19 = arith.subf %10, %18 : vector<4x8x1xf32>
    %20 = math.exp %19 : vector<4x8x1xf32>
    %21 = vector.broadcast %18 : vector<4x8x1xf32> to vector<4x8x8xf32>
    %22 = arith.subf %8, %21 : vector<4x8x8xf32>
    %23 = math.exp %22 : vector<4x8x8xf32>
    %c0_22 = arith.constant 0 : index
    %c0_23 = arith.constant 0 : index
    %c0_24 = arith.constant 0 : index
    %24 = vector.load %arg9[%c0_22, %c0_23, %c0_24] : memref<4x8x1xf32, #tpu.memory_space<vmem>>, vector<4x8x1xf32>
    %25 = arith.mulf %20, %24 : vector<4x8x1xf32>
    %cst_25 = arith.constant dense<0.000000e+00> : vector<4x8xf32>
    %26 = vector.multi_reduction <add>, %23, %cst_25 [2] : vector<4x8x8xf32> to vector<4x8xf32>
    %27 = vector.shape_cast %26 : vector<4x8xf32> to vector<4x8x1xf32>
    %28 = arith.addf %25, %27 : vector<4x8x1xf32>
    %c0_26 = arith.constant 0 : index
    %c0_27 = arith.constant 0 : index
    %c0_28 = arith.constant 0 : index
    %29 = vector.load %arg9[%c0_26, %c0_27, %c0_28] : memref<4x8x1xf32, #tpu.memory_space<vmem>>, vector<4x8x1xf32>
    tpu.vector_store %arg9[%c0_26, %c0_27, %c0_28], %28 {strides = array<i32>} : memref<4x8x1xf32, #tpu.memory_space<vmem>>, vector<4x8x1xf32>,
    %cst_29 = arith.constant dense<0.000000e+00> : vector<4x8x32xf32>
    %30 = tpu.matmul %23, %7, %cst_29 {dimension_numbers = #tpu.dot_dimension_numbers<[2], [1], [1], [2], [0, 0, 0, 1, 1, 2], [0], [0]>} : vector<4x8x8xf32>, vector<4x8x32xf32>, vector<4x8x32xf32> -> vector<4x8x32xf32>
    %c0_30 = arith.constant 0 : index
    %c0_31 = arith.constant 0 : index
    %c0_32 = arith.constant 0 : index
    %31 = vector.load %arg10[%c0_30, %c0_31, %c0_32] : memref<4x8x32xf32, #tpu.memory_space<vmem>>, vector<4x8x32xf32>
    %32 = vector.broadcast %20 : vector<4x8x1xf32> to vector<4x8x32xf32>
    %33 = arith.mulf %32, %31 : vector<4x8x32xf32>
    %34 = arith.addf %33, %30 : vector<4x8x32xf32>
    %c0_33 = arith.constant 0 : index
    %c0_34 = arith.constant 0 : index
    %c0_35 = arith.constant 0 : index
    %35 = vector.load %arg10[%c0_33, %c0_34, %c0_35] : memref<4x8x32xf32, #tpu.memory_space<vmem>>, vector<4x8x32xf32>
    tpu.vector_store %arg10[%c0_33, %c0_34, %c0_35], %34 {strides = array<i32>} : memref<4x8x32xf32, #tpu.memory_space<vmem>>, vector<4x8x32xf32>,
    %c0_i32_36 = arith.constant 0 : i32
    %36 = arith.cmpi eq, %arg2, %c0_i32_36 : i32
    %37 = arith.extui %36 : i1 to i32
    %c0_i32_37 = arith.constant 0 : i32
    %38 = arith.cmpi ne, %37, %c0_i32_37 : i32
    scf.if %38 {
      %c0_38 = arith.constant 0 : index
      %c0_39 = arith.constant 0 : index
      %c0_40 = arith.constant 0 : index
      %39 = vector.load %arg9[%c0_38, %c0_39, %c0_40] : memref<4x8x1xf32, #tpu.memory_space<vmem>>, vector<4x8x1xf32>
      %40 = tpu.reciprocal %39 : vector<4x8x1xf32> -> vector<4x8x1xf32>
      %c0_41 = arith.constant 0 : index
      %c0_42 = arith.constant 0 : index
      %c0_43 = arith.constant 0 : index
      %41 = vector.load %arg10[%c0_41, %c0_42, %c0_43] : memref<4x8x32xf32, #tpu.memory_space<vmem>>, vector<4x8x32xf32>
      %42 = vector.broadcast %40 : vector<4x8x1xf32> to vector<4x8x32xf32>
      %43 = arith.mulf %41, %42 : vector<4x8x32xf32>
      %c0_44 = arith.constant 0 : index
      %c0_45 = arith.constant 0 : index
      %c0_46 = arith.constant 0 : index
      %44 = vector.load %arg6[%c0_44, %c0_45, %c0_46] : memref<4x8x32xf32, #tpu.memory_space<vmem>>, vector<4x8x32xf32>
      tpu.vector_store %arg6[%c0_44, %c0_45, %c0_46], %43 {strides = array<i32>} : memref<4x8x32xf32, #tpu.memory_space<vmem>>, vector<4x8x32xf32>,
      %c0_47 = arith.constant 0 : index
      %c0_48 = arith.constant 0 : index
      %c0_49 = arith.constant 0 : index
      %45 = vector.load %arg7[%c0_47, %c0_48, %c0_49] : memref<4x8x8xf32, #tpu.memory_space<vmem>>, vector<4x8x8xf32>
      %c0_50 = arith.constant 0 : index
      %c0_51 = arith.constant 0 : index
      %c0_52 = arith.constant 0 : index
      %46 = vector.load %arg8[%c0_50, %c0_51, %c0_52] : memref<4x8x1xf32, #tpu.memory_space<vmem>>, vector<4x8x1xf32>
      %47 = vector.broadcast %46 : vector<4x8x1xf32> to vector<4x8x8xf32>
      %48 = arith.subf %45, %47 : vector<4x8x8xf32>
      %49 = math.exp %48 : vector<4x8x8xf32>
      %50 = vector.broadcast %40 : vector<4x8x1xf32> to vector<4x8x8xf32>
      %51 = arith.mulf %49, %50 : vector<4x8x8xf32>
      %c0_53 = arith.constant 0 : index
      %c0_54 = arith.constant 0 : index
      %c0_55 = arith.constant 0 : index
      %52 = vector.load %arg7[%c0_53, %c0_54, %c0_55] : memref<4x8x8xf32, #tpu.memory_space<vmem>>, vector<4x8x8xf32>
      tpu.vector_store %arg7[%c0_53, %c0_54, %c0_55], %51 {strides = array<i32>} : memref<4x8x8xf32, #tpu.memory_space<vmem>>, vector<4x8x8xf32>,
    } else {
    }
    return
  }
  func.func @transform_0(%arg0: i32, %arg1: i32, %arg2: i32) -> (i32, i32, i32) {
    %c0_i32 = arith.constant 0 : i32
    %c0_i32_0 = arith.constant 0 : i32
    return %arg0, %arg1, %c0_i32 : i32, i32, i32
  }
  func.func @transform_1(%arg0: i32, %arg1: i32, %arg2: i32) -> (i32, i32, i32) {
    %c0_i32 = arith.constant 0 : i32
    %c0_i32_0 = arith.constant 0 : i32
    return %arg0, %arg2, %c0_i32 : i32, i32, i32
  }
  func.func @transform_2(%arg0: i32, %arg1: i32, %arg2: i32) -> (i32, i32, i32) {
    %c0_i32 = arith.constant 0 : i32
    %c0_i32_0 = arith.constant 0 : i32
    return %arg0, %arg2, %c0_i32 : i32, i32, i32
  }
  func.func @transform_3(%arg0: i32, %arg1: i32, %arg2: i32) -> (i32, i32, i32) {
    %c0_i32 = arith.constant 0 : i32
    %c0_i32_0 = arith.constant 0 : i32
    return %arg0, %arg1, %c0_i32 : i32, i32, i32
  }
  func.func @transform_4(%arg0: i32, %arg1: i32, %arg2: i32) -> (i32, i32, i32) {
    %c0_i32 = arith.constant 0 : i32
    %c0_i32_0 = arith.constant 0 : i32
    return %arg0, %arg1, %c0_i32 : i32, i32, i32
  }
}

</mosaic_0001>

<bundles_post_ra>
// kernel: tpu_custom_call.1
= control target key start
LH: loop header
LB: loop body
LE: loop exit
PB: predicated region body
PF: predicated region fallthrough
CT: control target
= control target key end

     0   :  { %10 = vsyncpa [#allocation6], 0  ;;  %s1447_s0 = inlined_call_operand.hbm [shape: f32[4,8,32], index: 0, kind: input, shape index: {}]   ;;  %s1448_s1 = inlined_call_operand.hbm [shape: f32[4,8,32], index: 1, kind: input, shape index: {}]   ;;  %s1449_s2 = inlined_call_operand.hbm [shape: f32[4,8,32], index: 2, kind: input, shape index: {}]   ;;  %s1450_s3 = inlined_call_operand.hbm [shape: f32[4,8,32], index: 3, kind: output, shape index: {0}]   ;;  %s1451_s4 = inlined_call_operand.hbm [shape: f32[4,8,8], index: 4, kind: output, shape index: {1}]  }
   0x1   :  { %11 = vsyncpa [#allocation9], 0 }
   0x2   :  { %12 = vsyncpa [#allocation7], 0 }
   0x3   :  { %13 = vsyncpa [#allocation13], 0  ;;  %s1192_s15 = smov [#allocation8]   ;;  %s1193_s17 = smov [#allocation5]  }
   0x4   :  { %s31_s16 = sshll.u32 %s1192_s15, 4  ;;  %s19_s18 = sshll.u32 %s1193_s17, 4  ;;  %s32_s16 = int_to_ptr.vmem [resolvable:$true] %s31_s16  ;;  %s1228_s18 = int_to_ptr.vmem [resolvable:$true] %s19_s18 }
   0x5   :  { %s1074_s21 = scalar_lea.hbm %s1448_s1, 512 }
   0x6   :  { %p1075_p0 = scmp.ne.s32.totalorder %s1448_s1, %s1074_s21  ;;  %p1078_p1 = scmp.lt.u32.totalorder %s1074_s21, %s1448_s1 }
   0x8   :  { %p1080_p2 = pnand %p1078_p1, %p1075_p0 }
   0xa   :  { %1083 = shalt.err (!%p1080_p2)
}
   0xb   :  { %s1084_s26 = scalar_lea.vmem %s32_s16, 512  ;;  %p1089_p4 = scmp.lt.s32.totalorder %s32_s16, %s32_s16 }
   0xc   :  { %p1085_p3 = scmp.ne.s32.totalorder %s32_s16, %s1084_s26  ;;  %p1090_p5 = scmp.lt.s32.totalorder %s1084_s26, %s1084_s26 }
   0xe   :  { %p1091_p6 = por %p1090_p5, %p1089_p4 }
  0x10   :  { %p1092_p7 = pnand %p1091_p6, %p1085_p3 }
  0x12   :  { %1095 = shalt.err (!%p1092_p7)
}
  0x13   :  { %s1194_s27 = smov 128   ;;  %s1195_s28 = smov 8  }
  0x14   :  { %37 = dma.hbm_to_vmem [thread:$0]  %s1448_s1, 512, %s32_s16, [#allocation9], %s1194_s27, %s1194_s27, %s1195_s28  }
  0x15   :  { %s1096_s7 = scalar_lea.hbm %s1447_s0, 512 }
  0x16   :  { %p1097_p8 = scmp.ne.s32.totalorder %s1447_s0, %s1096_s7  ;;  %p1100_p9 = scmp.lt.u32.totalorder %s1096_s7, %s1447_s0 }
  0x18   :  { %p1102_p10 = pnand %p1100_p9, %p1097_p8 }
  0x1a   :  { %1105 = shalt.err (!%p1102_p10)
}
  0x1b   :  { %s1106_s12 = scalar_lea.vmem %s1228_s18, 512  ;;  %p1111_p12 = scmp.lt.s32.totalorder %s1228_s18, %s1228_s18 }
  0x1c   :  { %p1107_p11 = scmp.ne.s32.totalorder %s1228_s18, %s1106_s12  ;;  %p1112_p13 = scmp.lt.s32.totalorder %s1106_s12, %s1106_s12 }
  0x1e   :  { %p1113_p0 = por %p1112_p13, %p1111_p12 }
  0x20   :  { %p1114_p1 = pnand %p1113_p0, %p1107_p11 }
  0x22   :  { %1117 = shalt.err (!%p1114_p1)
}
  0x23   :  { %25 = dma.hbm_to_vmem [thread:$0]  %s1447_s0, 512, %s1228_s18, [#allocation6], %s1194_s27, %s1194_s27, %s1195_s28  }
  0x24   :  { %s1196_s14 = smov [#allocation10]   ;;  %s1118_s19 = scalar_lea.hbm %s1449_s2, 512 }
  0x25   :  { %s43_s15 = sshll.u32 %s1196_s14, 4  ;;  %p1119_p2 = scmp.ne.s32.totalorder %s1449_s2, %s1118_s19  ;;  %s44_s15 = int_to_ptr.vmem [resolvable:$true] %s43_s15 }
  0x26   :  { %p1122_p3 = scmp.lt.u32.totalorder %s1118_s19, %s1449_s2 }
  0x28   :  { %p1124_p4 = pnand %p1122_p3, %p1119_p2 }
  0x2a   :  { %1127 = shalt.err (!%p1124_p4)
}
  0x2b   :  { %s1128_s24 = scalar_lea.vmem %s44_s15, 512  ;;  %p1133_p6 = scmp.lt.s32.totalorder %s44_s15, %s44_s15 }
  0x2c   :  { %p1129_p5 = scmp.ne.s32.totalorder %s44_s15, %s1128_s24  ;;  %p1134_p7 = scmp.lt.s32.totalorder %s1128_s24, %s1128_s24 }
  0x2e   :  { %p1135_p8 = por %p1134_p7, %p1133_p6 }
  0x30   :  { %p1136_p9 = pnand %p1135_p8, %p1129_p5 }
  0x32   :  { %1139 = shalt.err (!%p1136_p9)
}
  0x33   :  { %49 = dma.hbm_to_vmem [thread:$0]  %s1449_s2, 512, %s44_s15, [#allocation9], %s1194_s27, %s1194_s27, %s1195_s28  }
  0x34   :  { %1184 = dma.done.wait [#allocation6], 512  }
  0x35   :  { %1185 = vsyncadd [#allocation6], 4294966784 }
  0x36   :  { %1186 = dma.done.wait [#allocation9], 1024  }
  0x37   :  { %1187 = vsyncadd [#allocation9], 4294966272  ;;  %vm72_vm0 = vcmask 261120   ;;  %v1197_v0 = vmov 0.0   ;;  %vm1198_vm1 = vmmov 0   ;;  %v85_v1 = vld [vmem:[#allocation8] sm:$0xff] }
  0x38   :  { %989 = vmatprep.subr.mxu0 %v1197_v0  ;;  %73 = vst.msk [vmem:[#allocation4] sm:$0xff] %vm72_vm0, %v1197_v0  ;;  %74 = vst.msk [vmem:[#allocation4 + $0x8] sm:$0xff] %vm72_vm0, %v1197_v0  ;;  %991 = vmatprep.mubr.msk.f32.mxu0 %vm1198_vm1, %v1197_v0  ;;  %v77_v2 = vld [vmem:[#allocation5] sm:$0xff]  ;;  %v86_v3 = vld [vmem:[#allocation8 + $0x8] sm:$0xff]  ;;  %vm63_vm2 = vcmask 7168   ;;  %v1199_v13 = vmov -inf  }
  0x39   :  { %75 = vst.msk [vmem:[#allocation4 + $0x10] sm:$0xff] %vm72_vm0, %v1197_v0  ;;  %76 = vst.msk [vmem:[#allocation4 + $0x18] sm:$0xff] %vm72_vm0, %v1197_v0  ;;  %994 = vmatprep.subr.mxu1 %v1197_v0  ;;  %996 = vmatprep.mubr.msk.f32.mxu1 %vm1198_vm1, %v1197_v0  ;;  %v81_v4 = vmul.f32 0.17677669, %v77_v2  ;;  %v78_v5 = vld [vmem:[#allocation5 + $0x8] sm:$0xff]  ;;  %v79_v6 = vld [vmem:[#allocation5 + $0x10] sm:$0xff] }
  0x3a   :  { %990 = vmatpush3.xpose.msk.msra.mxu0 %vm72_vm0, %v85_v1  ;;  %995 = vmatpush3.xpose.msk.msra.mxu1 %vm72_vm0, %v86_v3  ;;  %v82_v7 = vmul.f32 0.17677669, %v78_v5  ;;  %v87_v8 = vld [vmem:[#allocation8 + $0x10] sm:$0xff]  ;;  %v80_v9 = vld [vmem:[#allocation5 + $0x18] sm:$0xff]  ;;  %v83_v11 = vmul.f32 0.17677669, %v79_v6 }
  0x3b   :  { %999 = vmatprep.subr.mxu0 %v1197_v0  ;;  %1004 = vmatprep.subr.mxu1 %v1197_v0  ;;  %v88_v10 = vld [vmem:[#allocation8 + $0x18] sm:$0xff]  ;;  %v84_v12 = vmul.f32 0.17677669, %v80_v9  ;;  %64 = vst.msk [vmem:[#allocation2] sm:$0xff] %vm63_vm2, %v1199_v13  ;;  %65 = vst.msk [vmem:[#allocation2 + $0x8] sm:$0xff] %vm63_vm2, %v1199_v13  ;;  %vm398_vm3 = vcmask 64512  }
  0x3c   :  { %66 = vst.msk [vmem:[#allocation2 + $0x10] sm:$0xff] %vm63_vm2, %v1199_v13  ;;  %67 = vst.msk [vmem:[#allocation2 + $0x18] sm:$0xff] %vm63_vm2, %v1199_v13  ;;  %v1200_v26 = vmov 0   ;;  %v89_v47 = vld [vmem:[#allocation10] sm:$0xff]  ;;  %v90_v48 = vld [vmem:[#allocation10 + $0x8] sm:$0xff]  ;;  %s1201_s2 = smov [#allocation11]  }
  0x3d   :  { %992 = vmatmul.mubr.msk.f32.vlgmr.msra.gmra.mrb[0].mxu0 %vm72_vm0, %v81_v4  ;;  %997 = vmatmul.mubr.msk.f32.vlgmr.msra.gmra.mrb[0].mxu1 %vm72_vm0, %v82_v7  ;;  %68 = vst.msk [vmem:[#allocation3] sm:$0xff] %vm63_vm2, %v1197_v0  ;;  %69 = vst.msk [vmem:[#allocation3 + $0x8] sm:$0xff] %vm63_vm2, %v1197_v0  ;;  %v91_v60 = vld [vmem:[#allocation10 + $0x10] sm:$0xff]  ;;  %v92_v1 = vld [vmem:[#allocation10 + $0x18] sm:$0xff]  ;;  %s932_s25 = sshll.u32 %s1201_s2, 4  ;;  %s1202_s26 = smov [#allocation12]   ;;  %s933_s25 = int_to_ptr.vmem [resolvable:$true] %s932_s25 }
  0x3e   :  { %1000 = vmatpush3.xpose.msk.msra.mxu0 %vm72_vm0, %v87_v8  ;;  %1001 = vmatprep.mubr.msk.f32.mxu0 %vm1198_vm1, %v1197_v0  ;;  %70 = vst.msk [vmem:[#allocation3 + $0x10] sm:$0xff] %vm63_vm2, %v1197_v0  ;;  %71 = vst.msk [vmem:[#allocation3 + $0x18] sm:$0xff] %vm63_vm2, %v1197_v0  ;;  %s944_s29 = sshll.u32 %s1202_s26, 4  ;;  %s1140_s30 = scalar_lea.vmem %s933_s25, 512  ;;  %s1408_s29 = int_to_ptr.vmem [resolvable:$true] %s944_s29 }
  0x3f   :  { %1005 = vmatpush3.xpose.msk.msra.mxu1 %vm72_vm0, %v88_v10  ;;  %1006 = vmatprep.mubr.msk.f32.mxu1 %vm1198_vm1, %v1197_v0  ;;  %p1141_p10 = scmp.ne.s32.totalorder %s933_s25, %s1140_s30  ;;  %p1145_p11 = scmp.lt.s32.totalorder %s933_s25, %s933_s25 }
  0x40   :  { %1009 = vmatprep.subr.mxu0 %v1197_v0  ;;  %1014 = vmatprep.subr.mxu1 %v1197_v0  ;;  %p1146_p12 = scmp.lt.s32.totalorder %s1140_s30, %s1140_s30 }
  0x41   :  { %1002 = vmatmul.mubr.msk.f32.vlgmr.msra.gmra.mrb[2].mxu0 %vm72_vm0, %v83_v11  ;;  %1040 = vset.pattern.permute.xlu0 %v1200_v26 }
  0x42   :  { %1007 = vmatmul.mubr.msk.f32.vlgmr.msra.gmra.mrb[2].mxu1 %vm72_vm0, %v84_v12  ;;  %1011 = vmatprep.mubr.msk.f32.mxu0 %vm1198_vm1, %v1197_v0  ;;  %v1346_v27 = vld [vmem:[#allocation2] sm:$0xff]  ;;  %v1349_v30 = vld [vmem:[#allocation2 + $0x8] sm:$0xff]  ;;  %p1147_p13 = por %p1146_p12, %p1145_p11 }
  0x43   :  { %1016 = vmatprep.mubr.msk.f32.mxu1 %vm1198_vm1, %v1197_v0  ;;  %1041 = vset.pattern.permute.xlu1 %v1200_v26  ;;  %v1351_v31 = vld [vmem:[#allocation2 + $0x10] sm:$0xff]  ;;  %v1361_v38 = vld [vmem:[#allocation2 + $0x18] sm:$0xff] }
  0x44   :  { %1010 = vmatpush3.msra.mxu0 %v89_v47  ;;  %1015 = vmatpush3.msra.mxu1 %v90_v48  ;;  %v800_v47 = vld [vmem:[#allocation4] sm:$0xff]  ;;  %p1148_p0 = pnand %p1147_p13, %p1141_p10 }
  0x45   :  { %1019 = vmatprep.subr.mxu0 %v1197_v0  ;;  %1024 = vmatprep.subr.mxu1 %v1197_v0  ;;  %v482_v26 = vld [vmem:[#allocation3 + $0x10] sm:$0xff] }
 0x110   :  { %v1326_v14 = vpop.f32.mrb[0].mxu0  ;;  %v1328_v15 = vpop.f32.mrb[0].mxu1 }
 0x111   :  { %399 = vst.msk [vmem:[#allocation12] sm:$0xff] %vm398_vm3, %v1326_v14  ;;  %v993_v16 = vpop.f32.mrb[1].mxu0  ;;  %v407_v17 = vsel %vm398_vm3, %v1326_v14, -inf  ;;  %400 = vst.msk [vmem:[#allocation12 + $0x8] sm:$0xff] %vm398_vm3, %v1328_v15  ;;  %v998_v18 = vpop.f32.mrb[1].mxu1  ;;  %v410_v19 = vsel %vm398_vm3, %v1328_v15, -inf }
 0x112   :  { %408 = vmax.xlane.f32.xlu0 %v407_v17 }
 0x114   :  { %v318_v20 = vpop.f32.mrb[2].mxu0 }
 0x115   :  { %401 = vst.msk [vmem:[#allocation12 + $0x10] sm:$0xff] %vm398_vm3, %v318_v20  ;;  %v1003_v21 = vpop.f32.mrb[3].mxu0  ;;  %v413_v22 = vsel %vm398_vm3, %v318_v20, -inf  ;;  %v1340_v23 = vpop.f32.mrb[2].mxu1 }
 0x116   :  { %411 = vmax.xlane.f32.xlu0 %v410_v19  ;;  %414 = vmax.xlane.f32.xlu1 %v413_v22  ;;  %402 = vst.msk [vmem:[#allocation12 + $0x18] sm:$0xff] %vm398_vm3, %v1340_v23  ;;  %v1008_v24 = vpop.f32.mrb[3].mxu1  ;;  %v416_v25 = vsel %vm398_vm3, %v1340_v23, -inf  ;;  %v480_v19 = vld [vmem:[#allocation3] sm:$0xff]  ;;  %v481_v22 = vld [vmem:[#allocation3 + $0x8] sm:$0xff] }
 0x11a   :  { %417 = vmax.xlane.f32.xlu1 %v416_v25 }
 0x19f   :  { %v409_v28 = vpop.xlane.xlu0 %408 }
 0x1a0   :  { %v419_v29 = vmax.f32 %v1346_v27, %v409_v28 }
 0x1a2   :  { %424 = vst.msk [vmem:[#allocation2] sm:$0xff] %vm63_vm2, %v419_v29  ;;  %vm428_vm4 = vcmp.eq.f32.partialorder %v419_v29, -inf }
 0x1a3   :  { %v412_v32 = vpop.xlane.xlu0 %411  ;;  %v1354_v33 = vsel %vm428_vm4, 0.0, %v419_v29  ;;  %v415_v34 = vpop.xlane.xlu1 %414 }
 0x1a4   :  { %v420_v35 = vmax.f32 %v1349_v30, %v412_v32  ;;  %450 = vperm.xlu0 %1040, %v1354_v33   ;;  %v436_v36 = vsub.f32 %v1346_v27, %v1354_v33  ;;  %v421_v37 = vmax.f32 %v1351_v31, %v415_v34 }
 0x1a6   :  { %425 = vst.msk [vmem:[#allocation2 + $0x8] sm:$0xff] %vm63_vm2, %v420_v35  ;;  %426 = vst.msk [vmem:[#allocation2 + $0x10] sm:$0xff] %vm63_vm2, %v421_v37  ;;  %vm429_vm5 = vcmp.eq.f32.partialorder %v420_v35, -inf  ;;  %vm430_vm6 = vcmp.eq.f32.partialorder %v421_v37, -inf }
 0x1a7   :  { %v433_v39 = vsel %vm429_vm5, 0.0, %v420_v35  ;;  %v418_v40 = vpop.xlane.xlu1 %417  ;;  %v1365_v41 = vsel %vm430_vm6, 0.0, %v421_v37 }
 0x1a8   :  { %455 = vperm.xlu1 %1041, %v433_v39   ;;  %v437_v42 = vsub.f32 %v1349_v30, %v433_v39  ;;  %v422_v43 = vmax.f32 %v1361_v38, %v418_v40  ;;  %v438_v44 = vsub.f32 %v1351_v31, %v1365_v41  ;;  %v483_v30 = vld [vmem:[#allocation3 + $0x18] sm:$0xff] }
 0x1a9   :  { %v883_v11 = vld [vmem:[#allocation2] sm:$0xff] }
 0x1aa   :  { %427 = vst.msk [vmem:[#allocation2 + $0x18] sm:$0xff] %vm63_vm2, %v422_v43  ;;  %vm431_vm7 = vcmp.eq.f32.partialorder %v422_v43, -inf  ;;  %v442_v8 = vmul.f32 1.442695, %v437_v42  ;;  %v444_v13 = vmul.f32 1.442695, %v438_v44 }
 0x1ab   :  { %v435_v45 = vsel %vm431_vm7, 0.0, %v422_v43 }
 0x1ac   :  { %460 = vperm.xlu1 %1041, %v1365_v41   ;;  %v439_v46 = vsub.f32 %v1361_v38, %v435_v45 }
 0x1ad   :  { %v884_v10 = vld [vmem:[#allocation2 + $0x8] sm:$0xff] }
 0x1ae   :  { %v446_v9 = vmul.f32 1.442695, %v439_v46 }
 0x1b0   :  { %465 = vperm.xlu1 %1041, %v435_v45  }
 0x1b1   :  { %v886_v16 = vld [vmem:[#allocation2 + $0x18] sm:$0xff] }
 0x223   :  { %v451_v49 = vpop.permute.xlu0 %450 }
 0x224   :  { %v468_v50 = vsub.f32 %v1326_v14, %v451_v49  ;;  %v885_v14 = vld [vmem:[#allocation2 + $0x10] sm:$0xff] }
 0x226   :  { %v472_v51 = vmul.f32 1.442695, %v468_v50  ;;  %v801_v50 = vld [vmem:[#allocation4 + $0x8] sm:$0xff] }
 0x227   :  { %v456_v52 = vpop.permute.xlu1 %455 }
 0x228   :  { %1042 = vpow2.f32 %v472_v51  ;;  %v469_v53 = vsub.f32 %v1328_v15, %v456_v52 }
 0x22a   :  { %v474_v54 = vmul.f32 1.442695, %v469_v53 }
 0x22b   :  { %v461_v55 = vpop.permute.xlu1 %460 }
 0x22c   :  { %1044 = vpow2.f32 %v474_v54  ;;  %v470_v56 = vsub.f32 %v318_v20, %v461_v55 }
 0x22e   :  { %v476_v57 = vmul.f32 1.442695, %v470_v56  ;;  %v802_v56 = vld [vmem:[#allocation4 + $0x10] sm:$0xff] }
 0x22f   :  { %v466_v58 = vpop.permute.xlu1 %465 }
 0x230   :  { %1046 = vpow2.f32 %v476_v57  ;;  %v471_v59 = vsub.f32 %v1340_v23, %v466_v58 }
 0x232   :  { %v1043_v61 = vpop.eup %1042  ;;  %v478_v62 = vmul.f32 1.442695, %v471_v59 }
 0x233   :  { %1012 = vmatmul.mubr.msk.f32.vlgmr.msra.gmra.mrb[4].mxu0 %vm398_vm3, %v1043_v61  ;;  %v488_v63 = vsel %vm398_vm3, %v1043_v61, 0.0 }
 0x234   :  { %1048 = vpow2.f32 %v478_v62  ;;  %489 = vadd.xlane.f32.xlu1 %v488_v63  ;;  %1020 = vmatpush3.msra.mxu0 %v91_v60  ;;  %v803_v62 = vld [vmem:[#allocation4 + $0x18] sm:$0xff] }
 0x235   :  { %1021 = vmatprep.mubr.msk.f32.mxu0 %vm1198_vm1, %v1197_v0  ;;  %1050 = vpow2.f32 %v442_v8  ;;  %v879_v8 = vld [vmem:[#allocation12] sm:$0xff] }
 0x236   :  { %v1045_v2 = vpop.eup %1044  ;;  %1052 = vpow2.f32 %v446_v9 }
 0x237   :  { %1017 = vmatmul.mubr.msk.f32.vlgmr.msra.gmra.mrb[4].mxu1 %vm398_vm3, %v1045_v2  ;;  %v491_v3 = vsel %vm398_vm3, %v1045_v2, 0.0 }
 0x238   :  { %492 = vadd.xlane.f32.xlu0 %v491_v3  ;;  %1025 = vmatpush3.msra.mxu1 %v92_v1 }
 0x239   :  { %1026 = vmatprep.mubr.msk.f32.mxu1 %vm1198_vm1, %v1197_v0  ;;  %v440_v0 = vmul.f32 1.442695, %v436_v36 }
 0x23a   :  { %v1047_v4 = vpop.eup %1046 }
 0x23b   :  { %1022 = vmatmul.mubr.msk.f32.vlgmr.msra.gmra.mrb[6].mxu0 %vm398_vm3, %v1047_v4  ;;  %v494_v5 = vsel %vm398_vm3, %v1047_v4, 0.0  ;;  %1054 = vpow2.f32 %v440_v0 }
 0x23c   :  { %495 = vadd.xlane.f32.xlu1 %v494_v5  ;;  %1056 = vpow2.f32 %v444_v13 }
 0x23e   :  { %v1049_v6 = vpop.eup %1048 }
 0x23f   :  { %1027 = vmatmul.mubr.msk.f32.vlgmr.msra.gmra.mrb[6].mxu1 %vm398_vm3, %v1049_v6  ;;  %v497_v7 = vsel %vm398_vm3, %v1049_v6, 0.0  ;;  %v1051_v12 = vpop.eup %1050 }
 0x240   :  { %498 = vadd.xlane.f32.xlu1 %v497_v7  ;;  %v1053_v15 = vpop.eup %1052  ;;  %v485_v24 = vmul.f32 %v1051_v12, %v481_v22 }
 0x241   :  { %v487_v33 = vmul.f32 %v1053_v15, %v483_v30 }
 0x245   :  { %v1055_v17 = vpop.eup %1054 }
 0x246   :  { %v1057_v18 = vpop.eup %1056  ;;  %v484_v20 = vmul.f32 %v1055_v17, %v480_v19 }
 0x247   :  { %v486_v28 = vmul.f32 %v1057_v18, %v482_v26 }
 0x24e   :  { %894 = vperm.xlu0 %1040, %v884_v10   ;;  %v880_v10 = vld [vmem:[#allocation12 + $0x8] sm:$0xff] }
 0x251   :  { %889 = vperm.xlu1 %1041, %v883_v11  }
 0x252   :  { %811 = vperm.xlu0 %1040, %v1051_v12   ;;  %v881_v12 = vld [vmem:[#allocation12 + $0x10] sm:$0xff] }
 0x255   :  { %899 = vperm.xlu1 %1041, %v885_v14  }
 0x256   :  { %821 = vperm.xlu0 %1040, %v1053_v15   ;;  %v882_v15 = vld [vmem:[#allocation12 + $0x18] sm:$0xff] }
 0x259   :  { %904 = vperm.xlu1 %1041, %v886_v16  }
 0x25d   :  { %806 = vperm.xlu1 %1041, %v1055_v17  }
 0x261   :  { %816 = vperm.xlu1 %1041, %v1057_v18  }
 0x2c1   :  { %v490_v21 = vpop.xlane.xlu1 %489 }
 0x2c2   :  { %v500_v23 = vadd.f32 %v490_v21, %v484_v20 }
 0x2c4   :  { %504 = vst.msk [vmem:[#allocation3] sm:$0xff] %vm63_vm2, %v500_v23 }
 0x2c5   :  { %v493_v25 = vpop.xlane.xlu0 %492 }
 0x2c6   :  { %v501_v27 = vadd.f32 %v493_v25, %v485_v24 }
 0x2c8   :  { %505 = vst.msk [vmem:[#allocation3 + $0x8] sm:$0xff] %vm63_vm2, %v501_v27 }
 0x2c9   :  { %v496_v29 = vpop.xlane.xlu1 %495 }
 0x2ca   :  { %v502_v31 = vadd.f32 %v496_v29, %v486_v28 }
 0x2cb   :  { %v839_v32 = vld [vmem:[#allocation3] sm:$0xff] }
 0x2cc   :  { %506 = vst.msk [vmem:[#allocation3 + $0x10] sm:$0xff] %vm63_vm2, %v502_v31  ;;  %1058 = vrcp.f32 %v839_v32 }
 0x2cd   :  { %v499_v34 = vpop.xlane.xlu1 %498  ;;  %v895_v46 = vpop.permute.xlu0 %894 }
 0x2ce   :  { %v503_v35 = vadd.f32 %v499_v34, %v487_v33  ;;  %v908_v0 = vsub.f32 %v880_v10, %v895_v46 }
 0x2cf   :  { %v840_v36 = vld [vmem:[#allocation3 + $0x8] sm:$0xff] }
 0x2d0   :  { %507 = vst.msk [vmem:[#allocation3 + $0x18] sm:$0xff] %vm63_vm2, %v503_v35  ;;  %1060 = vrcp.f32 %v840_v36  ;;  %v913_v13 = vmul.f32 1.442695, %v908_v0 }
 0x2d1   :  { %v890_v43 = vpop.permute.xlu1 %889  ;;  %v812_v51 = vpop.permute.xlu0 %811 }
 0x2d2   :  { %v825_v55 = vmul.f32 %v812_v51, %v801_v50  ;;  %v907_v9 = vsub.f32 %v879_v8, %v890_v43 }
 0x2d3   :  { %v841_v37 = vld [vmem:[#allocation3 + $0x10] sm:$0xff] }
 0x2d4   :  { %1062 = vrcp.f32 %v841_v37  ;;  %v911_v11 = vmul.f32 1.442695, %v907_v9 }
 0x2d5   :  { %v900_v44 = vpop.permute.xlu1 %899  ;;  %v822_v63 = vpop.permute.xlu0 %821 }
 0x2d6   :  { %v1059_v38 = vpop.eup %1058  ;;  %v827_v4 = vmul.f32 %v822_v63, %v803_v62  ;;  %v909_v14 = vsub.f32 %v881_v12, %v900_v44 }
 0x2d7   :  { %853 = vperm.xlu1 %1041, %v1059_v38   ;;  %v842_v39 = vld [vmem:[#allocation3 + $0x18] sm:$0xff] }
 0x2d8   :  { %1064 = vrcp.f32 %v842_v39  ;;  %v915_v16 = vmul.f32 1.442695, %v909_v14 }
 0x2d9   :  { %v905_v45 = vpop.permute.xlu1 %904  ;;  %1066 = vpow2.f32 %v911_v11 }
 0x2da   :  { %v1061_v40 = vpop.eup %1060  ;;  %1068 = vpow2.f32 %v913_v13  ;;  %v910_v17 = vsub.f32 %v882_v15, %v905_v45 }
 0x2db   :  { %858 = vperm.xlu0 %1040, %v1061_v40   ;;  %1070 = vpow2.f32 %v915_v16 }
 0x2dc   :  { %v917_v18 = vmul.f32 1.442695, %v910_v17 }
 0x2dd   :  { %v807_v48 = vpop.permute.xlu1 %806 }
 0x2de   :  { %v1063_v41 = vpop.eup %1062  ;;  %v824_v49 = vmul.f32 %v807_v48, %v800_v47  ;;  %1072 = vpow2.f32 %v917_v18 }
 0x2df   :  { %863 = vperm.xlu1 %1041, %v1063_v41  }
 0x2e1   :  { %v817_v57 = vpop.permute.xlu1 %816 }
 0x2e2   :  { %v1065_v42 = vpop.eup %1064  ;;  %v826_v61 = vmul.f32 %v817_v57, %v802_v56 }
 0x2e3   :  { %868 = vperm.xlu0 %1040, %v1065_v42   ;;  %v1067_v19 = vpop.eup %1066 }
 0x2e4   :  { %v1069_v24 = vpop.eup %1068 }
 0x2e5   :  { %v1071_v29 = vpop.eup %1070 }
 0x2e8   :  { %v1073_v34 = vpop.eup %1072 }
 0x306   :  { %v577_v52 = vpop.f32.mrb[4].mxu0 }
 0x307   :  { %v828_v53 = vadd.f32 %v824_v49, %v577_v52  ;;  %v1013_v54 = vpop.f32.mrb[5].mxu0 }
 0x309   :  { %832 = vst.msk [vmem:[#allocation4] sm:$0xff] %vm72_vm0, %v828_v53 }
 0x30a   :  { %v650_v58 = vpop.f32.mrb[4].mxu1 }
 0x30b   :  { %v829_v59 = vadd.f32 %v825_v55, %v650_v58  ;;  %v1018_v60 = vpop.f32.mrb[5].mxu1 }
 0x30d   :  { %833 = vst.msk [vmem:[#allocation4 + $0x8] sm:$0xff] %vm72_vm0, %v829_v59 }
 0x30e   :  { %v723_v1 = vpop.f32.mrb[6].mxu0 }
 0x30f   :  { %v830_v2 = vadd.f32 %v826_v61, %v723_v1  ;;  %v1023_v3 = vpop.f32.mrb[7].mxu0 }
 0x310   :  { %v847_v20 = vld [vmem:[#allocation4] sm:$0xff] }
 0x311   :  { %834 = vst.msk [vmem:[#allocation4 + $0x10] sm:$0xff] %vm72_vm0, %v830_v2 }
 0x312   :  { %v796_v5 = vpop.f32.mrb[6].mxu1 }
 0x313   :  { %v831_v6 = vadd.f32 %v827_v4, %v796_v5  ;;  %v1028_v7 = vpop.f32.mrb[7].mxu1 }
 0x314   :  { %v848_v25 = vld [vmem:[#allocation4 + $0x8] sm:$0xff] }
 0x315   :  { %835 = vst.msk [vmem:[#allocation4 + $0x18] sm:$0xff] %vm72_vm0, %v831_v6 }
 0x318   :  { %v849_v30 = vld [vmem:[#allocation4 + $0x10] sm:$0xff] }
 0x31c   :  { %v850_v35 = vld [vmem:[#allocation4 + $0x18] sm:$0xff] }
 0x356   :  { %v854_v21 = vpop.permute.xlu1 %853 }
 0x357   :  { %v871_v22 = vmul.f32 %v854_v21, %v847_v20  ;;  %v919_v23 = vmul.f32 %v1067_v19, %v854_v21 }
 0x359   :  { %875 = vst.msk [vmem:[#allocation11] sm:$0xff] %vm72_vm0, %v871_v22 }
 0x35a   :  { %923 = vst.msk [vmem:[#allocation12] sm:$0xff] %vm398_vm3, %v919_v23  ;;  %v859_v26 = vpop.permute.xlu0 %858 }
 0x35b   :  { %v872_v27 = vmul.f32 %v859_v26, %v848_v25  ;;  %v920_v28 = vmul.f32 %v1069_v24, %v859_v26 }
 0x35d   :  { %876 = vst.msk [vmem:[#allocation11 + $0x8] sm:$0xff] %vm72_vm0, %v872_v27 }
 0x35e   :  { %924 = vst.msk [vmem:[#allocation12 + $0x8] sm:$0xff] %vm398_vm3, %v920_v28  ;;  %v864_v31 = vpop.permute.xlu1 %863 }
 0x35f   :  { %v873_v32 = vmul.f32 %v864_v31, %v849_v30  ;;  %v921_v33 = vmul.f32 %v1071_v29, %v864_v31 }
 0x361   :  { %877 = vst.msk [vmem:[#allocation11 + $0x10] sm:$0xff] %vm72_vm0, %v873_v32 }
 0x362   :  { %925 = vst.msk [vmem:[#allocation12 + $0x10] sm:$0xff] %vm398_vm3, %v921_v33  ;;  %v869_v36 = vpop.permute.xlu0 %868 }
 0x363   :  { %v874_v37 = vmul.f32 %v869_v36, %v850_v35  ;;  %v922_v38 = vmul.f32 %v1073_v34, %v869_v36 }
 0x365   :  { %878 = vst.msk [vmem:[#allocation11 + $0x18] sm:$0xff] %vm72_vm0, %v874_v37 }
 0x366   :  { %926 = vst.msk [vmem:[#allocation12 + $0x18] sm:$0xff] %vm398_vm3, %v922_v38 }
 0x367   :  { %1151 = shalt.err (!%p1148_p0)
}
 0x368   :  { %s1152_s7 = scalar_lea.hbm %s1450_s3, 512 }
 0x369   :  { %p1153_p1 = scmp.ne.s32.totalorder %s1450_s3, %s1152_s7  ;;  %p1156_p2 = scmp.lt.u32.totalorder %s1152_s7, %s1450_s3 }
 0x36b   :  { %p1158_p3 = pnand %p1156_p2, %p1153_p1 }
 0x36d   :  { %1161 = shalt.err (!%p1158_p3)
}
 0x36e   :  { %938 = dma.vmem_to_hbm [thread:$0]  %s933_s25, 512, %s1450_s3, [#allocation7], %s1194_s27, %s1194_s27, %s1195_s28  }
 0x36f   :  { %s1162_s13 = scalar_lea.vmem %s1408_s29, 512  ;;  %p1167_p5 = scmp.lt.s32.totalorder %s1408_s29, %s1408_s29 }
 0x370   :  { %p1163_p4 = scmp.ne.s32.totalorder %s1408_s29, %s1162_s13  ;;  %p1168_p6 = scmp.lt.s32.totalorder %s1162_s13, %s1162_s13 }
 0x372   :  { %p1169_p7 = por %p1168_p6, %p1167_p5 }
 0x374   :  { %p1170_p8 = pnand %p1169_p7, %p1163_p4 }
 0x376   :  { %1173 = shalt.err (!%p1170_p8)
}
 0x377   :  { %s1174_s16 = scalar_lea.hbm %s1451_s4, 512 }
 0x378   :  { %p1175_p9 = scmp.ne.s32.totalorder %s1451_s4, %s1174_s16  ;;  %p1178_p10 = scmp.lt.u32.totalorder %s1174_s16, %s1451_s4 }
 0x37a   :  { %p1180_p11 = pnand %p1178_p10, %p1175_p9 }
 0x37c   :  { %1183 = shalt.err (!%p1180_p11)
}
 0x37d   :  { %950 = dma.vmem_to_hbm [thread:$0]  %s1408_s29, 512, %s1451_s4, [#allocation13], %s1194_s27, %s1194_s27, %s1195_s28  }
 0x37e   :  { %1188 = dma.done.wait [#allocation7], 512  }
 0x37f   :  { %1189 = vsyncadd [#allocation7], 4294966784 }
 0x380   :  { %1190 = dma.done.wait [#allocation13], 512  }
 0x381   :  { %1191 = vsyncadd [#allocation13], 4294966784 }
 0x382   :  { %957 = vsyncpa [#allocation6], 1 }
 0x383   :  { %958 = vsyncpa [#allocation9], 1 }
 0x384   :  { %959 = vsyncpa [#allocation7], 1 }
 0x385   :  { %960 = vsyncpa [#allocation13], 1 }

</bundles_post_ra>
